<compile_context>
chip_gen: v7x
topology: tpu7x:2x2x1
jax: 0.10.0
libtpu: 0.0.40
codegen_flags: <defaults>
</compile_context>

<pallas_src>
import jax
import jax.numpy as jnp
from jax.experimental import pallas as pl
from jax.experimental.pallas import tpu as pltpu

# ---------------------------------------------------------------------------
# Static sizes
# ---------------------------------------------------------------------------
IN_DIM = 50      # fc1 input features
HID = 200        # fc1/fc2/fc3 output features
OUT_DIM = 30     # fc4 output features

H_PAD = 256      # hidden width padded to 2 x 128 lanes
OUT_PAD = 128    # output width padded to a full lane group
TB = 128         # batch-tile (sublane) size per grid step


def _mlp_kernel(x_ref,
                w1_ref, b1_ref,
                w2_ref, b2_ref,
                w3_ref, b3_ref,
                w4_ref, b4_ref,
                o_ref):
    """One (TB, *) batch tile through all four layers. Weights are VMEM-resident."""
    # Layer 1: (TB,50)bf16 @ (50,256)bf16 -> f32 acc, +bias, ReLU, back to bf16
    h = jnp.dot(x_ref[...], w1_ref[...], preferred_element_type=jnp.float32)
    h = jnp.maximum(h + b1_ref[...], 0.0).astype(jnp.bfloat16)
    # Layer 2: (TB,256) @ (256,256)
    h = jnp.dot(h, w2_ref[...], preferred_element_type=jnp.float32)
    h = jnp.maximum(h + b2_ref[...], 0.0).astype(jnp.bfloat16)
    # Layer 3: (TB,256) @ (256,256)
    h = jnp.dot(h, w3_ref[...], preferred_element_type=jnp.float32)
    h = jnp.maximum(h + b3_ref[...], 0.0).astype(jnp.bfloat16)
    # Layer 4: (TB,256) @ (256,128) + bias, no activation
    out = jnp.dot(h, w4_ref[...], preferred_element_type=jnp.float32) + b4_ref[...]
    o_ref[...] = out.astype(o_ref.dtype)


def _pad_to(a, shape):
    """Zero-pad a 2-D array up to `shape` (trailing pads only)."""
    pads = tuple((0, t - s) for s, t in zip(a.shape, shape))
    return jnp.pad(a, pads)


def net50_forward(x, params):
    """x: (B, 50) float32. params: w1..w4 as (in, out) f32, b1..b4 as (1, out) f32.

    Returns (B, 30) float32, numerically matching x @ W + b (W = torch weight.T)
    up to bf16 input/weight precision.
    """
    B = x.shape[0]
    n_tiles = (B + TB - 1) // TB
    B_pad = n_tiles * TB

    # --- pad + cast operands (done once per call, outside the kernel) ---------
    w1 = _pad_to(params["w1"], (IN_DIM, H_PAD)).astype(jnp.bfloat16)
    w2 = _pad_to(params["w2"], (H_PAD, H_PAD)).astype(jnp.bfloat16)
    w3 = _pad_to(params["w3"], (H_PAD, H_PAD)).astype(jnp.bfloat16)
    w4 = _pad_to(params["w4"], (H_PAD, OUT_PAD)).astype(jnp.bfloat16)
    b1 = _pad_to(params["b1"], (1, H_PAD))
    b2 = _pad_to(params["b2"], (1, H_PAD))
    b3 = _pad_to(params["b3"], (1, H_PAD))
    b4 = _pad_to(params["b4"], (1, OUT_PAD))

    xb = x.astype(jnp.bfloat16)
    if B_pad != B:
        xb = jnp.pad(xb, ((0, B_pad - B), (0, 0)))

    # --- BlockSpecs ------------------------------------------------------------
    # x / output tiles advance with the grid; weight/bias blocks are constant
    # (block index (0,0) every step) so Pallas keeps them resident in VMEM.
    x_spec = pl.BlockSpec((TB, IN_DIM), lambda i: (i, 0))
    o_spec = pl.BlockSpec((TB, OUT_PAD), lambda i: (i, 0))

    def resident(shape):
        return pl.BlockSpec(shape, lambda i: (0, 0))

    flops = 2 * B_pad * (IN_DIM * H_PAD + 2 * H_PAD * H_PAD + H_PAD * OUT_PAD)
    bytes_accessed = (
        xb.size * 2
        + (w1.size + w2.size + w3.size + w4.size) * 2
        + (b1.size + b2.size + b3.size + b4.size) * 4
        + B_pad * OUT_PAD * 4
    )

    out_padded = pl.pallas_call(
        _mlp_kernel,
        out_shape=jax.ShapeDtypeStruct((B_pad, OUT_PAD), jnp.float32),
        grid=(n_tiles,),
        in_specs=[
            x_spec,
            resident((IN_DIM, H_PAD)), resident((1, H_PAD)),
            resident((H_PAD, H_PAD)), resident((1, H_PAD)),
            resident((H_PAD, H_PAD)), resident((1, H_PAD)),
            resident((H_PAD, OUT_PAD)), resident((1, OUT_PAD)),
        ],
        out_specs=o_spec,
        compiler_params=pltpu.CompilerParams(
            dimension_semantics=("parallel",)),
        cost_estimate=pl.CostEstimate(
            flops=flops, transcendentals=0, bytes_accessed=bytes_accessed),
    )(xb, w1, b1, w2, b2, w3, b3, w4, b4)

    return out_padded[:B, :OUT_DIM]


def init_params(key):
    """Deterministic init mimicking PyTorch nn.Linear default:
    U(-1/sqrt(fan_in), 1/sqrt(fan_in)) for weight and bias. Weights stored as
    (in_features, out_features) == torch weight.T so y = x @ W + b."""
    dims = [(IN_DIM, HID), (HID, HID), (HID, HID), (HID, OUT_DIM)]
    params = {}
    keys = jax.random.split(key, 2 * len(dims))
    for i, (fan_in, fan_out) in enumerate(dims):
        bound = 1.0 / (fan_in ** 0.5)
        w = jax.random.uniform(keys[2 * i], (fan_in, fan_out),
                               minval=-bound, maxval=bound, dtype=jnp.float32)
        b = jax.random.uniform(keys[2 * i + 1], (1, fan_out),
                               minval=-bound, maxval=bound, dtype=jnp.float32)
        params[f"w{i + 1}"] = w
        params[f"b{i + 1}"] = b
    return params


def net50_reference(x, params):
    """Pure-JAX f32 reference for correctness checking."""
    h = jnp.maximum(x @ params["w1"] + params["b1"], 0.0)
    h = jnp.maximum(h @ params["w2"] + params["b2"], 0.0)
    h = jnp.maximum(h @ params["w3"] + params["b3"], 0.0)
    return h @ params["w4"] + params["b4"]


if __name__ == "__main__":
    key = jax.random.PRNGKey(0)
    pkey, xkey = jax.random.split(key)
    params = init_params(pkey)

    # Two batch tiles so the pipelined grid actually iterates; still a small shape.
    B = 256
    x = jax.random.normal(xkey, (B, IN_DIM), dtype=jnp.float32)

    out = net50_forward(x, params)
    out = jax.block_until_ready(out)

    ref = net50_reference(x, params)
    assert out.shape == (B, OUT_DIM), out.shape
    # bf16 weights/activations => loosened tolerance vs. f32 reference.
    assert jnp.allclose(out, ref, atol=5e-2, rtol=5e-2), (
        "mismatch vs reference; max abs err = "
        f"{float(jnp.max(jnp.abs(out - ref)))}")

    # Also exercise a batch that is NOT a multiple of the tile size.
    B2 = 37
    x2 = jax.random.normal(jax.random.PRNGKey(1), (B2, IN_DIM), dtype=jnp.float32)
    out2 = jax.block_until_ready(net50_forward(x2, params))
    ref2 = net50_reference(x2, params)
    assert out2.shape == (B2, OUT_DIM)
    assert jnp.allclose(out2, ref2, atol=5e-2, rtol=5e-2), "ragged-batch mismatch"

    print("KERNEL_OK")
</pallas_src>

<mosaic_0001>
module attributes {stable_mosaic.version = 11 : i64} {
  func.func @_mlp_kernel(%arg0: i32, %arg1: memref<128x50xbf16, #tpu.memory_space<vmem>>, %arg2: memref<50x256xbf16, #tpu.memory_space<vmem>>, %arg3: memref<1x256xf32, #tpu.memory_space<vmem>>, %arg4: memref<256x256xbf16, #tpu.memory_space<vmem>>, %arg5: memref<1x256xf32, #tpu.memory_space<vmem>>, %arg6: memref<256x256xbf16, #tpu.memory_space<vmem>>, %arg7: memref<1x256xf32, #tpu.memory_space<vmem>>, %arg8: memref<256x128xbf16, #tpu.memory_space<vmem>>, %arg9: memref<1x128xf32, #tpu.memory_space<vmem>>, %arg10: memref<128x128xf32, #tpu.memory_space<vmem>>) attributes {dimension_semantics = [#tpu.dimension_semantics<parallel>], iteration_bounds = array<i64: 2>, scalar_prefetch = 0 : i64, scratch_operands = 0 : i64, tpu.core_type = #tpu.core_type<tc>, window_params = [{transform_indices = @transform_0, window_bounds = array<i64: 128, 50>}, {pipeline_mode = #tpu.pipeline_mode<synchronous>, transform_indices = @transform_1, window_bounds = array<i64: 50, 256>}, {pipeline_mode = #tpu.pipeline_mode<synchronous>, transform_indices = @transform_2, window_bounds = array<i64: 1, 256>}, {pipeline_mode = #tpu.pipeline_mode<synchronous>, transform_indices = @transform_3, window_bounds = array<i64: 256, 256>}, {pipeline_mode = #tpu.pipeline_mode<synchronous>, transform_indices = @transform_4, window_bounds = array<i64: 1, 256>}, {pipeline_mode = #tpu.pipeline_mode<synchronous>, transform_indices = @transform_5, window_bounds = array<i64: 256, 256>}, {pipeline_mode = #tpu.pipeline_mode<synchronous>, transform_indices = @transform_6, window_bounds = array<i64: 1, 256>}, {pipeline_mode = #tpu.pipeline_mode<synchronous>, transform_indices = @transform_7, window_bounds = array<i64: 256, 128>}, {pipeline_mode = #tpu.pipeline_mode<synchronous>, transform_indices = @transform_8, window_bounds = array<i64: 1, 128>}, {transform_indices = @transform_9, window_bounds = array<i64: 128, 128>}]} {
    %c0 = arith.constant 0 : index
    %c0_0 = arith.constant 0 : index
    %0 = vector.load %arg1[%c0, %c0_0] : memref<128x50xbf16, #tpu.memory_space<vmem>>, vector<128x50xbf16>
    %c0_1 = arith.constant 0 : index
    %c0_2 = arith.constant 0 : index
    %1 = vector.load %arg2[%c0_1, %c0_2] : memref<50x256xbf16, #tpu.memory_space<vmem>>, vector<50x256xbf16>
    %cst = arith.constant dense<0.000000e+00> : vector<128x256xf32>
    %2 = tpu.matmul %0, %1, %cst {dimension_numbers = #tpu.dot_dimension_numbers<[1], [0], [0], [1], [0, 0, 1, 1], [], []>} : vector<128x50xbf16>, vector<50x256xbf16>, vector<128x256xf32> -> vector<128x256xf32>
    %c0_3 = arith.constant 0 : index
    %c0_4 = arith.constant 0 : index
    %3 = vector.load %arg3[%c0_3, %c0_4] : memref<1x256xf32, #tpu.memory_space<vmem>>, vector<1x256xf32>
    %4 = vector.broadcast %3 : vector<1x256xf32> to vector<128x256xf32>
    %5 = arith.addf %2, %4 : vector<128x256xf32>
    %cst_5 = arith.constant 0.000000e+00 : f32
    %6 = vector.broadcast %cst_5 : f32 to vector<128x256xf32>
    %7 = arith.maximumf %5, %6 : vector<128x256xf32>
    %8 = arith.truncf %7 : vector<128x256xf32> to vector<128x256xbf16>
    %c0_6 = arith.constant 0 : index
    %c0_7 = arith.constant 0 : index
    %9 = vector.load %arg4[%c0_6, %c0_7] : memref<256x256xbf16, #tpu.memory_space<vmem>>, vector<256x256xbf16>
    %cst_8 = arith.constant dense<0.000000e+00> : vector<128x256xf32>
    %10 = tpu.matmul %8, %9, %cst_8 {dimension_numbers = #tpu.dot_dimension_numbers<[1], [0], [0], [1], [0, 0, 1, 1], [], []>} : vector<128x256xbf16>, vector<256x256xbf16>, vector<128x256xf32> -> vector<128x256xf32>
    %c0_9 = arith.constant 0 : index
    %c0_10 = arith.constant 0 : index
    %11 = vector.load %arg5[%c0_9, %c0_10] : memref<1x256xf32, #tpu.memory_space<vmem>>, vector<1x256xf32>
    %12 = vector.broadcast %11 : vector<1x256xf32> to vector<128x256xf32>
    %13 = arith.addf %10, %12 : vector<128x256xf32>
    %cst_11 = arith.constant 0.000000e+00 : f32
    %14 = vector.broadcast %cst_11 : f32 to vector<128x256xf32>
    %15 = arith.maximumf %13, %14 : vector<128x256xf32>
    %16 = arith.truncf %15 : vector<128x256xf32> to vector<128x256xbf16>
    %c0_12 = arith.constant 0 : index
    %c0_13 = arith.constant 0 : index
    %17 = vector.load %arg6[%c0_12, %c0_13] : memref<256x256xbf16, #tpu.memory_space<vmem>>, vector<256x256xbf16>
    %cst_14 = arith.constant dense<0.000000e+00> : vector<128x256xf32>
    %18 = tpu.matmul %16, %17, %cst_14 {dimension_numbers = #tpu.dot_dimension_numbers<[1], [0], [0], [1], [0, 0, 1, 1], [], []>} : vector<128x256xbf16>, vector<256x256xbf16>, vector<128x256xf32> -> vector<128x256xf32>
    %c0_15 = arith.constant 0 : index
    %c0_16 = arith.constant 0 : index
    %19 = vector.load %arg7[%c0_15, %c0_16] : memref<1x256xf32, #tpu.memory_space<vmem>>, vector<1x256xf32>
    %20 = vector.broadcast %19 : vector<1x256xf32> to vector<128x256xf32>
    %21 = arith.addf %18, %20 : vector<128x256xf32>
    %cst_17 = arith.constant 0.000000e+00 : f32
    %22 = vector.broadcast %cst_17 : f32 to vector<128x256xf32>
    %23 = arith.maximumf %21, %22 : vector<128x256xf32>
    %24 = arith.truncf %23 : vector<128x256xf32> to vector<128x256xbf16>
    %c0_18 = arith.constant 0 : index
    %c0_19 = arith.constant 0 : index
    %25 = vector.load %arg8[%c0_18, %c0_19] : memref<256x128xbf16, #tpu.memory_space<vmem>>, vector<256x128xbf16>
    %cst_20 = arith.constant dense<0.000000e+00> : vector<128x128xf32>
    %26 = tpu.matmul %24, %25, %cst_20 {dimension_numbers = #tpu.dot_dimension_numbers<[1], [0], [0], [1], [0, 0, 1, 1], [], []>} : vector<128x256xbf16>, vector<256x128xbf16>, vector<128x128xf32> -> vector<128x128xf32>
    %c0_21 = arith.constant 0 : index
    %c0_22 = arith.constant 0 : index
    %27 = vector.load %arg9[%c0_21, %c0_22] : memref<1x128xf32, #tpu.memory_space<vmem>>, vector<1x128xf32>
    %28 = vector.broadcast %27 : vector<1x128xf32> to vector<128x128xf32>
    %29 = arith.addf %26, %28 : vector<128x128xf32>
    %c0_23 = arith.constant 0 : index
    %c0_24 = arith.constant 0 : index
    %30 = vector.load %arg10[%c0_23, %c0_24] : memref<128x128xf32, #tpu.memory_space<vmem>>, vector<128x128xf32>
    tpu.vector_store %arg10[%c0_23, %c0_24], %29 {strides = array<i32>} : memref<128x128xf32, #tpu.memory_space<vmem>>, vector<128x128xf32>,
    return
  }
  func.func @transform_0(%arg0: i32) -> (i32, i32) {
    %c0_i32 = arith.constant 0 : i32
    %c0_i32_0 = arith.constant 0 : i32
    return %arg0, %c0_i32 : i32, i32
  }
  func.func @transform_1(%arg0: i32) -> (i32, i32) {
    %c0_i32 = arith.constant 0 : i32
    %c0_i32_0 = arith.constant 0 : i32
    %c0_i32_1 = arith.constant 0 : i32
    return %c0_i32, %c0_i32_0 : i32, i32
  }
  func.func @transform_2(%arg0: i32) -> (i32, i32) {
    %c0_i32 = arith.constant 0 : i32
    %c0_i32_0 = arith.constant 0 : i32
    %c0_i32_1 = arith.constant 0 : i32
    return %c0_i32, %c0_i32_0 : i32, i32
  }
  func.func @transform_3(%arg0: i32) -> (i32, i32) {
    %c0_i32 = arith.constant 0 : i32
    %c0_i32_0 = arith.constant 0 : i32
    %c0_i32_1 = arith.constant 0 : i32
    return %c0_i32, %c0_i32_0 : i32, i32
  }
  func.func @transform_4(%arg0: i32) -> (i32, i32) {
    %c0_i32 = arith.constant 0 : i32
    %c0_i32_0 = arith.constant 0 : i32
    %c0_i32_1 = arith.constant 0 : i32
    return %c0_i32, %c0_i32_0 : i32, i32
  }
  func.func @transform_5(%arg0: i32) -> (i32, i32) {
    %c0_i32 = arith.constant 0 : i32
    %c0_i32_0 = arith.constant 0 : i32
    %c0_i32_1 = arith.constant 0 : i32
    return %c0_i32, %c0_i32_0 : i32, i32
  }
  func.func @transform_6(%arg0: i32) -> (i32, i32) {
    %c0_i32 = arith.constant 0 : i32
    %c0_i32_0 = arith.constant 0 : i32
    %c0_i32_1 = arith.constant 0 : i32
    return %c0_i32, %c0_i32_0 : i32, i32
  }
  func.func @transform_7(%arg0: i32) -> (i32, i32) {
    %c0_i32 = arith.constant 0 : i32
    %c0_i32_0 = arith.constant 0 : i32
    %c0_i32_1 = arith.constant 0 : i32
    return %c0_i32, %c0_i32_0 : i32, i32
  }
  func.func @transform_8(%arg0: i32) -> (i32, i32) {
    %c0_i32 = arith.constant 0 : i32
    %c0_i32_0 = arith.constant 0 : i32
    %c0_i32_1 = arith.constant 0 : i32
    return %c0_i32, %c0_i32_0 : i32, i32
  }
  func.func @transform_9(%arg0: i32) -> (i32, i32) {
    %c0_i32 = arith.constant 0 : i32
    %c0_i32_0 = arith.constant 0 : i32
    return %arg0, %c0_i32 : i32, i32
  }
}

</mosaic_0001>

<bundles_post_ra>
// kernel: tpu_custom_call.1
= control target key start
LH: loop header
LB: loop body
LE: loop exit
PB: predicated region body
PF: predicated region fallthrough
CT: control target
= control target key end

     0   :  { %14 = vsyncpa [#allocation3], 0  ;;  %s2785_s0 = inlined_call_operand.vmem [shape: bf16[256,50], index: 0, kind: input, shape index: {}]   ;;  %s2786_s1 = inlined_call_operand.vmem [shape: bf16[50,256], index: 1, kind: input, shape index: {}]   ;;  %s2787_s2 = inlined_call_operand.vmem [shape: f32[1,256], index: 2, kind: input, shape index: {}]   ;;  %s2788_s3 = inlined_call_operand.hbm [shape: bf16[256,256], index: 3, kind: input, shape index: {}]   ;;  %s2789_s4 = inlined_call_operand.vmem [shape: f32[1,256], index: 4, kind: input, shape index: {}]   ;;  %s2790_s5 = inlined_call_operand.hbm [shape: bf16[256,256], index: 5, kind: input, shape index: {}]   ;;  %s2791_s6 = inlined_call_operand.vmem [shape: f32[1,256], index: 6, kind: input, shape index: {}]   ;;  %s2792_s7 = inlined_call_operand.vmem [shape: bf16[256,128], index: 7, kind: input, shape index: {}]   ;;  %s2793_s8 = inlined_call_operand.vmem [shape: f32[1,128], index: 8, kind: input, shape index: {}]   ;;  %s2794_s9 = inlined_call_operand.hbm [shape: f32[256,128], index: 9, kind: output, shape index: {}]  }
   0x1   :  { %15 = vsyncpa [#allocation6], 0 }
   0x2   :  { %16 = vsyncpa [#allocation4], 0 }
   0x3   :  { %18 = vsyncpa [#allocation4 + $0x1], 0  ;;  %s2329_s30 = smov 0   ;;  %s2331_s10 = smov 0  }
   0x4   :  { %s2333_s11 = smov 0   ;;  %s2335_s12 = smov 0  }
   0x5 LB: > { %2801 = sst [smem:[#allocation11_spill]] %s2265_s11  ;;  %s2350_s13 = sadd.s32 4294967295, %s2269_s12   ;;  %s2269_s12 = sphi %s2335_s12, %s2815_s12   ;;  %s2265_s11 = sphi %s2333_s11, %s2817_s11   ;;  %s2261_s10 = sphi %s2331_s10, %s2819_s10   ;;  %s2257_s30 = sphi %s2329_s30, %s2818_s30  }
   0x6   : > { %s1744_s14 = sadd.s32 4294967294, %s2269_s12   ;;  %s2354_s15 = sadd.s32 1, %s2269_s12  }
   0x7   : > { %2802 = sst [smem:[#allocation12_spill]] %s2354_s15  ;;  %s225_s16 = sadd.s32 1, %s2265_s11 }
   0x8   : > { %s222_s17 = ssub.s32 %s2269_s12, %s2354_s15  ;;  %p235_p0 = scmp.ne.s32.totalorder %s2265_s11, %s2261_s10 }
   0x9   : > { %p223_p1 = scmp.eq.s32.totalorder %s222_s17, 0  ;;  %p236_p2 = scmp.eq.s32.totalorder %s2350_s13, 1 }
   0xa   : > { %p241_p3 = scmp.ne.s32.totalorder %s2261_s10, %s2257_s30  ;;  %p242_p4 = scmp.eq.s32.totalorder %s1744_s14, 1 }
   0xb   : > { %s2365_s18 = scalar_select %p223_p1, %s2265_s11, %s225_s16  }
   0xc   : > { %p2367_p5 = por %p236_p2, %p235_p0  ;;  %p2371_p6 = por %p242_p4, %p241_p3 }
   0xd   : > { %2803 = sst [smem:[#allocation13_spill]] %s2365_s18  ;;  %p1745_p7 = scmp.ge.s32.totalorder %s2269_s12, 1 }
   0xe   : > { %s2804_s19 = scalar_select %p2367_p5, 1, 0 }
   0xf   : > { %s2805_s20 = scalar_select %p2371_p6, 1, 0 }
  0x10   : > { %p249_p8 = scmp.lt.s32.totalorder %s2269_s12, 3  ;;  %p2795_p9 = scmp.eq.s32.totalorder %s2350_s13, 0 }
  0x11   : > { %s2271_s22 = smov [#allocation2]   ;;  %s2272_s25 = smov [#allocation5]  }
  0x12   : > { %p2378_p10 = pnand %p1745_p7, %p249_p8  ;;  %s267_s23 = sshll.u32 %s2271_s22, 4  ;;  %s268_s23 = int_to_ptr.vmem [resolvable:$true] %s267_s23 }
  0x13   : > { %s283_s26 = sshll.u32 %s2272_s25, 4  ;;  %s2143_s29 = scalar_lea.hbm %s2788_s3, 4096  ;;  %s2390_s26 = int_to_ptr.vmem [resolvable:$true] %s283_s26 }
  0x14   : > { %s2806_s21 = scalar_select %p2378_p10, 1, 0 }
  0x15   : > { %p1957_p11 = pneg %p2378_p10  ;;  %p2144_p13 = scmp.ne.s32.totalorder %s2788_s3, %s2143_s29 }
  0x16   : > { %p2150_p3 = scmp.lt.u32.totalorder %s2143_s29, %s2788_s3 }
  0x17   : > { %p2386_p12 = pnand %p2795_p9, %p1957_p11 }
  0x19   : > { %p2145_p0 = pneg %p2386_p12 }
  0x1b   : > { %p2146_p1 = pnand %p2145_p0, %p2144_p13 }
  0x1d   : > { %p2147_p2 = pneg %p2146_p1 }
  0x1f   : > { %p2152_p4 = pnand %p2150_p3, %p2147_p2 }
  0x21   : > { %2155 = shalt.err (!%p2152_p4)
}
  0x22   : > { %s2156_s25 = scalar_lea.vmem %s268_s23, 4096  ;;  %p2164_p9 = scmp.lt.s32.totalorder %s268_s23, %s268_s23 }
  0x23   : > { %p2157_p7 = scmp.ne.s32.totalorder %s268_s23, %s2156_s25  ;;  %p2165_p6 = scmp.lt.s32.totalorder %s2156_s25, %s2156_s25 }
  0x25   : > { %p2159_p8 = pnand %p2157_p7, %p2145_p0  ;;  %p2166_p5 = por %p2165_p6, %p2164_p9 }
  0x27   : > { %p2160_p11 = pneg %p2159_p8 }
  0x29   : > { %p2167_p10 = pnand %p2166_p5, %p2160_p11 }
  0x2b   : > { %2170 = shalt.err (!%p2167_p10)
}
  0x2c   : > { %s2273_s27 = smov 128   ;;  %s2274_s28 = smov 8  }
  0x2d   : > { %1960 = dma.hbm_to_vmem [thread:$0]  (!%p2386_p12), %s2788_s3, 4096, %s268_s23, [#allocation3], %s2273_s27, %s2273_s27, %s2274_s28  }
  0x2e   : > { %s2171_s22 = scalar_lea.hbm %s2790_s5, 4096 }
  0x2f   : > { %p2172_p13 = scmp.ne.s32.totalorder %s2790_s5, %s2171_s22  ;;  %p2178_p9 = scmp.lt.u32.totalorder %s2171_s22, %s2790_s5 }
  0x31   : > { %p2174_p5 = pnand %p2172_p13, %p2145_p0 }
  0x33   : > { %p2175_p6 = pneg %p2174_p5 }
  0x35   : > { %p2180_p10 = pnand %p2178_p9, %p2175_p6 }
  0x37   : > { %2183 = shalt.err (!%p2180_p10)
}
  0x38   : > { %s2184_s23 = scalar_lea.vmem %s2390_s26, 4096  ;;  %p2192_p4 = scmp.lt.s32.totalorder %s2390_s26, %s2390_s26 }
  0x39   : > { %p2185_p1 = scmp.ne.s32.totalorder %s2390_s26, %s2184_s23  ;;  %p2193_p7 = scmp.lt.s32.totalorder %s2184_s23, %s2184_s23 }
  0x3b   : > { %p2187_p2 = pnand %p2185_p1, %p2145_p0  ;;  %p2194_p8 = por %p2193_p7, %p2192_p4 }
  0x3d   : > { %p2188_p3 = pneg %p2187_p2 }
  0x3f   : > { %p2195_p11 = pnand %p2194_p8, %p2188_p3 }
  0x41   : > { %2198 = shalt.err (!%p2195_p11)
}
  0x42   : > { %1963 = dma.hbm_to_vmem [thread:$0]  (!%p2386_p12), %s2790_s5, 4096, %s2390_s26, [#allocation6], %s2273_s27, %s2273_s27, %s2274_s28  }
  0x43   : > { %p2808_p13 = scmp.ne.s32.totalorder %s2806_s21, 0 }
  0x44   : > { %p2809_p5 = scmp.eq.s32.totalorder (!%p2808_p13), %s2350_s13, 0 }
  0x45   : > { %317 = sbr.rel (%p2808_p13) target bundleno = 1054 (0x41e), region = 56 }
  0x4c   : > { %2244 = dma.done.wait (%p2809_p5), [#allocation3], 4096   ;;  %p2810_p0 = pmov %p2809_p5 }
  0x4e   : > { %2246 = vsyncadd (%p2810_p0), [#allocation3], 4294963200  ;;  %p2811_p6 = pmov %p2810_p0 }
  0x4f   : > { %p2812_p9 = pmov %p2810_p0 }
  0x50   : > { %2248 = dma.done.wait (%p2811_p6), [#allocation6], 4096  }
  0x51   : > { %2250 = vsyncadd (%p2812_p9), [#allocation6], 4294963200  ;;  %s1753_s18 = sshll.u32 %s2350_s13, 4  ;;  %v2275_v0 = vmov 0   ;;  %v2012_v1 = vld [vmem:[%s2786_s1 + $0x4] ss:$8 sps:$4 sm:$0xff]  }
  0x52   : > { %539 = vmatprep.mubr.bf16.mxu0 %v2275_v0  ;;  %p358_p12 = scmp.lt.s32.totalorder %s1753_s18, 31  ;;  %v2014_v2 = vld [vmem:[%s2786_s1] ss:$8 sps:$4 sm:$0xff]   ;;  %507 = vmatprep.subr.bf16.mxu0 %v2012_v1  ;;  %v2015_v3 = vld [vmem:[%s2786_s1 + $0x14] ss:$8 sps:$4 sm:$0xff]   ;;  %vm500_vm0 = vcmask 1040384  }
  0x53   : > { %508 = vmatpush1.bf16.msra.mxu0 %v2014_v2  ;;  %v2017_v4 = vld [vmem:[%s2786_s1 + $0x10] ss:$8 sps:$4 sm:$0xff]   ;;  %v2018_v5 = vld [vmem:[%s2786_s1 + $0x24] ss:$8 sps:$4 sm:$0xff]   ;;  %v2020_v7 = vld [vmem:[%s2786_s1 + $0x20] ss:$8 sps:$4 sm:$0xff]  }
  0x54   : > { %s2821_s18 = smov (!%p358_p12, %s1753_s18), 31  ;;  %509 = vmatprep.subr.bf16.mxu0 %v2015_v3  ;;  %v387_v6 = vld [vmem:[%s2786_s1 + $0x30] sm:$0x11]  ;;  %v2031_v11 = vld [vmem:[#allocation2 + $0x4] ss:$8 sps:$4 sm:$0xff]   ;;  %vm475_vm1 = vcmask 408576  }
  0x55   : > { %s1754_s26 = sshll.u32 %s2821_s18, 2  ;;  %v1770_v8 = vcombine.high %v387_v6, %v387_v6  ;;  %v1769_v9 = vcombine.low %v387_v6, %v387_v6  ;;  %v2033_v12 = vld [vmem:[#allocation2] ss:$8 sps:$4 sm:$0xff]   ;;  %v2034_v14 = vld [vmem:[#allocation2 + $0x14] ss:$8 sps:$4 sm:$0xff]   ;;  %872 = vmatprep.subr.bf16.mxu1 %v2031_v11  ;;  %s1866_s24 = sshll.u32 %s2350_s13, 11 }
  0x56   : > { %s2466_s23 = scalar_lea.vmem %s2785_s0, %s1754_s26  ;;  %873 = vmatpush1.bf16.msra.mxu1 %v2033_v12  ;;  %v2036_v15 = vld [vmem:[#allocation2 + $0x10] ss:$8 sps:$4 sm:$0xff]   ;;  %v2037_v16 = vld [vmem:[#allocation2 + $0x24] ss:$8 sps:$4 sm:$0xff]   ;;  %v2039_v17 = vld [vmem:[#allocation2 + $0x20] ss:$8 sps:$4 sm:$0xff]   ;;  %v390_v12 = vlaneseq  ;;  %s2735_s29 = scalar_lea.hbm %s2794_s9, %s1866_s24 }
  0x57   : > { %510 = vmatpush1.bf16.msra.mxu0 %v2017_v4  ;;  %v502_v10 = vsel %vm500_vm0, %v1769_v9, 0  ;;  %v2023_v13 = vld [vmem:[%s2466_s23] sm:$0xff]   ;;  %874 = vmatprep.subr.bf16.mxu1 %v2034_v14  ;;  %v2040_v18 = vld [vmem:[#allocation2 + $0x34] ss:$8 sps:$4 sm:$0xff]   ;;  %v2024_v19 = vld [vmem:[%s2466_s23 + $0x8] sm:$0xff]   ;;  %p2813_p1 = scmp.ne.s32.totalorder %s2804_s19, 0 }
  0x58   : > { %511 = vmatprep.subr.bf16.mxu0 %v2018_v5  ;;  %v2042_v20 = vld [vmem:[#allocation2 + $0x30] ss:$8 sps:$4 sm:$0xff]   ;;  %v2043_v21 = vld [vmem:[#allocation2 + $0x44] ss:$8 sps:$4 sm:$0xff]   ;;  %v2045_v22 = vld [vmem:[#allocation2 + $0x40] ss:$8 sps:$4 sm:$0xff]  }
  0x59   : > { %v2046_v23 = vld [vmem:[#allocation2 + $0x54] ss:$8 sps:$4 sm:$0xff]   ;;  %v2048_v25 = vld [vmem:[#allocation2 + $0x50] ss:$8 sps:$4 sm:$0xff]   ;;  %v2049_v26 = vld [vmem:[#allocation2 + $0x64] ss:$8 sps:$4 sm:$0xff]  }
  0x5a   : > { %875 = vmatpush1.bf16.msra.mxu1 %v2036_v15  ;;  %v2025_v24 = vld [vmem:[%s2466_s23 + $0x10] sm:$0xff]   ;;  %v2051_v27 = vld [vmem:[#allocation2 + $0x60] ss:$8 sps:$4 sm:$0xff]   ;;  %v2026_v29 = vld [vmem:[%s2466_s23 + $0x18] sm:$0xff]   ;;  %v391_v15 = vshrl.u32 %v390_v12, 7  ;;  %s2276_s16 = smov [#allocation7]  }
  0x5b   : > { %512 = vmatpush1.bf16.msra.mxu0 %v2020_v7  ;;  %876 = vmatprep.subr.bf16.mxu1 %v2037_v16  ;;  %v2052_v28 = vld [vmem:[#allocation2 + $0x74] ss:$8 sps:$4 sm:$0xff]   ;;  %v2054_v30 = vld [vmem:[#allocation2 + $0x70] ss:$8 sps:$4 sm:$0xff]   ;;  %v2055_v31 = vld [vmem:[#allocation2 + $0x84] ss:$8 sps:$4 sm:$0xff]  }
  0x5c   : > { %1771 = vmatprep.subr.msk.bf16.mxu0 %vm500_vm0, %v1770_v8  ;;  %v2057_v32 = vld [vmem:[#allocation2 + $0x80] ss:$8 sps:$4 sm:$0xff]   ;;  %v2058_v33 = vld [vmem:[#allocation2 + $0x94] ss:$8 sps:$4 sm:$0xff]   ;;  %v2060_v35 = vld [vmem:[#allocation2 + $0x90] ss:$8 sps:$4 sm:$0xff]  }
  0x5d   : > { %v2027_v34 = vld [vmem:[%s2466_s23 + $0x20] sm:$0xff]   ;;  %v2064_v38 = vld [vmem:[#allocation2 + $0xb4] ss:$8 sps:$4 sm:$0xff]   ;;  %v2028_v39 = vld [vmem:[%s2466_s23 + $0x28] sm:$0xff]   ;;  %s2203_s17 = sshll.u32 %s2276_s16, 4  ;;  %s2204_s17 = int_to_ptr.vmem [resolvable:$false] %s2203_s17 }
  0x5e   : > { %877 = vmatpush1.bf16.msra.mxu1 %v2039_v17  ;;  %v2061_v36 = vld [vmem:[#allocation2 + $0xa4] ss:$8 sps:$4 sm:$0xff]   ;;  %v2063_v37 = vld [vmem:[#allocation2 + $0xa0] ss:$8 sps:$4 sm:$0xff]   ;;  %v2066_v40 = vld [vmem:[#allocation2 + $0xb0] ss:$8 sps:$4 sm:$0xff]  }
  0x5f   : > { %514 = vmatpush1.bf16.msra.mxu0 %v502_v10  ;;  %878 = vmatprep.subr.bf16.mxu1 %v2040_v18  ;;  %v2067_v41 = vld [vmem:[#allocation2 + $0xc4] ss:$8 sps:$4 sm:$0xff]   ;;  %v2069_v42 = vld [vmem:[#allocation2 + $0xc0] ss:$8 sps:$4 sm:$0xff]   ;;  %v2070_v43 = vld [vmem:[#allocation2 + $0xd4] ss:$8 sps:$4 sm:$0xff]  }
  0x60   : > { %v2029_v44 = vld [vmem:[%s2466_s23 + $0x30] sm:$0xff]   ;;  %v2030_v45 = vld [vmem:[%s2466_s23 + $0x38] sm:$0xff]   ;;  %v2073_v47 = vld [vmem:[#allocation2 + $0xe4] ss:$8 sps:$4 sm:$0xff]   ;;  %v2500_v17 = vsub.s32 0, %v391_v15  ;;  %s354_s23 = sand.u32 1, %s2261_s10  }
  0x61   : > { %v2072_v46 = vld [vmem:[#allocation2 + $0xd0] ss:$8 sps:$4 sm:$0xff]   ;;  %v2075_v48 = vld [vmem:[#allocation2 + $0xe0] ss:$8 sps:$4 sm:$0xff]   ;;  %v2076_v49 = vld [vmem:[#allocation2 + $0xf4] ss:$8 sps:$4 sm:$0xff]  }
  0x62   : > { %1772 = vmatmul.mubr.msk.bf16.vlgmr.msra.gmra.mrb[0].mxu0 %vm475_vm1, %v2023_v13  ;;  %879 = vmatpush1.bf16.msra.mxu1 %v2042_v20  ;;  %v2078_v50 = vld [vmem:[#allocation2 + $0xf0] ss:$8 sps:$4 sm:$0xff]   ;;  %v2079_v51 = vld [vmem:[#allocation5] ss:$8 sps:$4 sm:$0xff]   ;;  %v2081_v52 = vld [vmem:[#allocation5 + $0x4] ss:$8 sps:$4 sm:$0xff]  }
  0x63   : > { %549 = vmatprep.mubr.bf16.mxu0 %v2275_v0  ;;  %880 = vmatprep.subr.bf16.mxu1 %v2043_v21  ;;  %v2084_v53 = vld [vmem:[#allocation5 + $0x14] ss:$8 sps:$4 sm:$0xff]   ;;  %v2082_v54 = vld [vmem:[#allocation5 + $0x10] ss:$8 sps:$4 sm:$0xff]   ;;  %v2087_v55 = vld [vmem:[#allocation5 + $0x24] ss:$8 sps:$4 sm:$0xff]  }
  0x64   : > { %1237 = vmatprep.subr.bf16.mxu0 %v2081_v52  ;;  %v2085_v56 = vld [vmem:[#allocation5 + $0x20] ss:$8 sps:$4 sm:$0xff]   ;;  %v2090_v57 = vld [vmem:[#allocation5 + $0x34] ss:$8 sps:$4 sm:$0xff]   ;;  %v2088_v58 = vld [vmem:[#allocation5 + $0x30] ss:$8 sps:$4 sm:$0xff]  }
  0x65   : > { %1238 = vmatpush1.bf16.msra.mxu0 %v2079_v51  ;;  %v2093_v59 = vld [vmem:[#allocation5 + $0x44] ss:$8 sps:$4 sm:$0xff]   ;;  %v2091_v60 = vld [vmem:[#allocation5 + $0x40] ss:$8 sps:$4 sm:$0xff]   ;;  %v2096_v61 = vld [vmem:[#allocation5 + $0x54] ss:$8 sps:$4 sm:$0xff]  }
  0x66   : > { %881 = vmatpush1.bf16.msra.mxu1 %v2045_v22  ;;  %1239 = vmatprep.subr.bf16.mxu0 %v2084_v53  ;;  %v2094_v62 = vld [vmem:[#allocation5 + $0x50] ss:$8 sps:$4 sm:$0xff]   ;;  %v2099_v63 = vld [vmem:[#allocation5 + $0x64] ss:$8 sps:$4 sm:$0xff]   ;;  %v2102_v1 = vld [vmem:[#allocation5 + $0x74] ss:$8 sps:$4 sm:$0xff]  }
  0x67   : > { %882 = vmatprep.subr.bf16.mxu1 %v2046_v23  ;;  %v2100_v2 = vld [vmem:[#allocation5 + $0x70] ss:$8 sps:$4 sm:$0xff]   ;;  %v2105_v3 = vld [vmem:[#allocation5 + $0x84] ss:$8 sps:$4 sm:$0xff]   ;;  %v2103_v4 = vld [vmem:[#allocation5 + $0x80] ss:$8 sps:$4 sm:$0xff]  }
  0x68   : > { %v2108_v5 = vld [vmem:[#allocation5 + $0x94] ss:$8 sps:$4 sm:$0xff]   ;;  %v2106_v6 = vld [vmem:[#allocation5 + $0x90] ss:$8 sps:$4 sm:$0xff]   ;;  %v2111_v7 = vld [vmem:[#allocation5 + $0xa4] ss:$8 sps:$4 sm:$0xff]  }
  0x69   : > { %1240 = vmatpush1.bf16.msra.mxu0 %v2082_v54  ;;  %v2109_v8 = vld [vmem:[#allocation5 + $0xa0] ss:$8 sps:$4 sm:$0xff]   ;;  %v2114_v9 = vld [vmem:[#allocation5 + $0xb4] ss:$8 sps:$4 sm:$0xff]   ;;  %v2112_v10 = vld [vmem:[#allocation5 + $0xb0] ss:$8 sps:$4 sm:$0xff]  }
  0x6a   : > { %1773 = vmatmul.mubr.msk.bf16.gmra.mrb[4].mxu0 %vm475_vm1, %v2024_v19  ;;  %883 = vmatpush1.bf16.msra.mxu1 %v2048_v25  ;;  %v2117_v11 = vld [vmem:[#allocation5 + $0xc4] ss:$8 sps:$4 sm:$0xff]   ;;  %v2115_v13 = vld [vmem:[#allocation5 + $0xc0] ss:$8 sps:$4 sm:$0xff]   ;;  %v2120_v14 = vld [vmem:[#allocation5 + $0xd4] ss:$8 sps:$4 sm:$0xff]  }
  0x6b   : > { %559 = vmatprep.mubr.bf16.mxu0 %v2275_v0  ;;  %884 = vmatprep.subr.bf16.mxu1 %v2049_v26  ;;  %v2118_v16 = vld [vmem:[#allocation5 + $0xd0] ss:$8 sps:$4 sm:$0xff]   ;;  %v388_v18 = vld [vmem:[%s2787_s2] sm:$0x3]  ;;  %v2505_v19 = vsub.s32 1, %v391_v15  ;;  %s1752_s11 = sshll.u32 %s354_s23, 7 }
  0x6c   : > { %1241 = vmatprep.subr.bf16.mxu0 %v2087_v55  ;;  %v2508_v20 = vrot.slane %v388_v18, %v2500_v17  ;;  %s2700_s21 = scalar_lea.vmem [#allocation7], %s1752_s11  ;;  %s2744_s13 = scalar_lea.sflag [#allocation4], %s354_s23 }
  0x6d   : > { %1242 = vmatpush1.bf16.msra.mxu0 %v2085_v56  ;;  %v2511_v21 = vrot.slane %v388_v18, %v2505_v19  ;;  %s1660_s27 = sshll.u32 %s2700_s21, 4  ;;  %s2205_s22 = scalar_lea.vmem %s2204_s17, 4096  ;;  %s2737_s27 = int_to_ptr.vmem [resolvable:$true] %s1660_s27 }
  0x6e   : > { %885 = vmatpush1.bf16.msra.mxu1 %v2051_v27  ;;  %1243 = vmatprep.subr.bf16.mxu0 %v2090_v57  ;;  %s2199_s14 = scalar_lea.vmem %s2737_s27, 2048  ;;  %p2206_p4 = scmp.lt.s32.totalorder %s2737_s27, %s2204_s17 }
  0x6f   : > { %886 = vmatprep.subr.bf16.mxu1 %v2052_v28  ;;  %p2200_p10 = scmp.ne.s32.totalorder %s2737_s27, %s2199_s14  ;;  %p2207_p7 = scmp.lt.s32.totalorder %s2205_s22, %s2199_s14 }
  0x71   : > { %1244 = vmatpush1.bf16.msra.mxu0 %v2088_v58  ;;  %p2201_p2 = pnand %p2200_p10, %p2813_p1  ;;  %p2208_p8 = por %p2207_p7, %p2206_p4 }
  0x72   : > { %1774 = vmatmul.mubr.msk.bf16.gmra.mrb[8].mxu0 %vm475_vm1, %v2025_v24  ;;  %887 = vmatpush1.bf16.msra.mxu1 %v2054_v30 }
  0x73   : > { %569 = vmatprep.mubr.bf16.mxu0 %v2275_v0  ;;  %888 = vmatprep.subr.bf16.mxu1 %v2055_v31  ;;  %p2202_p3 = pneg %p2201_p2 }
  0x74   : > { %1245 = vmatprep.subr.bf16.mxu0 %v2093_v59 }
  0x75   : > { %1246 = vmatpush1.bf16.msra.mxu0 %v2091_v60  ;;  %p2209_p11 = pnand %p2208_p8, %p2202_p3 }
  0x76   : > { %889 = vmatpush1.bf16.msra.mxu1 %v2057_v32  ;;  %1247 = vmatprep.subr.bf16.mxu0 %v2096_v61 }
  0x77   : > { %890 = vmatprep.subr.bf16.mxu1 %v2058_v33 }
  0x79   : > { %1248 = vmatpush1.bf16.msra.mxu0 %v2094_v62 }
  0x7a   : > { %1775 = vmatmul.mubr.msk.bf16.gmra.mrb[12].mxu0 %vm475_vm1, %v2026_v29  ;;  %891 = vmatpush1.bf16.msra.mxu1 %v2060_v35 }
  0x7b   : > { %579 = vmatprep.mubr.bf16.mxu0 %v2275_v0  ;;  %892 = vmatprep.subr.bf16.mxu1 %v2061_v36 }
  0x7c   : > { %1249 = vmatprep.subr.bf16.mxu0 %v2099_v63 }
  0x7e   : > { %893 = vmatpush1.bf16.msra.mxu1 %v2063_v37 }
  0x7f   : > { %894 = vmatprep.subr.bf16.mxu1 %v2064_v38 }
  0x82   : > { %1776 = vmatmul.mubr.msk.bf16.gmra.mrb[16].mxu0 %vm475_vm1, %v2027_v34  ;;  %895 = vmatpush1.bf16.msra.mxu1 %v2066_v40 }
  0x83   : > { %589 = vmatprep.mubr.bf16.mxu0 %v2275_v0  ;;  %896 = vmatprep.subr.bf16.mxu1 %v2067_v41 }
  0x86   : > { %897 = vmatpush1.bf16.msra.mxu1 %v2069_v42 }
  0x87   : > { %898 = vmatprep.subr.bf16.mxu1 %v2070_v43 }
  0x8a   : > { %1777 = vmatmul.mubr.msk.bf16.gmra.mrb[20].mxu0 %vm475_vm1, %v2028_v39  ;;  %899 = vmatpush1.bf16.msra.mxu1 %v2072_v46 }
  0x8b   : > { %599 = vmatprep.mubr.bf16.mxu0 %v2275_v0  ;;  %900 = vmatprep.subr.bf16.mxu1 %v2073_v47 }
  0x8e   : > { %901 = vmatpush1.bf16.msra.mxu1 %v2075_v48 }
  0x8f   : > { %902 = vmatprep.subr.bf16.mxu1 %v2076_v49 }
  0x92   : > { %1778 = vmatmul.mubr.msk.bf16.gmra.mrb[24].mxu0 %vm475_vm1, %v2029_v44  ;;  %903 = vmatpush1.bf16.msra.mxu1 %v2078_v50 }
  0x93   : > { %609 = vmatprep.mubr.bf16.mxu0 %v2275_v0  ;;  %v2097_v0 = vld [vmem:[#allocation5 + $0x60] ss:$8 sps:$4 sm:$0xff]  }
  0x94   : > { %1250 = vmatpush1.bf16.msra.mxu0 %v2097_v0 }
  0x95   : > { %1251 = vmatprep.subr.bf16.mxu0 %v2102_v1 }
  0x98   : > { %1252 = vmatpush1.bf16.msra.mxu0 %v2100_v2 }
  0x99   : > { %1253 = vmatprep.subr.bf16.mxu0 %v2105_v3 }
  0x9a   : > { %1779 = vmatmul.mubr.msk.bf16.gmra.mrb[28].mxu0 %vm475_vm1, %v2030_v45 }
  0x9c   : > { %1254 = vmatpush1.bf16.msra.mxu0 %v2103_v4 }
  0x9d   : > { %1255 = vmatprep.subr.bf16.mxu0 %v2108_v5 }
  0xa0   : > { %1256 = vmatpush1.bf16.msra.mxu0 %v2106_v6 }
  0xa1   : > { %1257 = vmatprep.subr.bf16.mxu0 %v2111_v7 }
  0xa4   : > { %1258 = vmatpush1.bf16.msra.mxu0 %v2109_v8 }
  0xa5   : > { %1259 = vmatprep.subr.bf16.mxu0 %v2114_v9 }
  0xa8   : > { %1260 = vmatpush1.bf16.msra.mxu0 %v2112_v10 }
  0xa9   : > { %1261 = vmatprep.subr.bf16.mxu0 %v2117_v11 }
  0xac   : > { %1262 = vmatpush1.bf16.msra.mxu0 %v2115_v13 }
  0xad   : > { %1263 = vmatprep.subr.bf16.mxu0 %v2120_v14 }
  0xb0   : > { %1264 = vmatpush1.bf16.msra.mxu0 %v2118_v16 }
 0x135   : > { %v541_v22 = vpop.f32.mrb[0].mxu0 }
 0x136   : > { %v542_v23 = vadd.f32 %v541_v22, %v2508_v20  ;;  %v543_v24 = vpop.f32.mrb[1].mxu0 }
 0x137   : > { %v544_v25 = vadd.f32 %v543_v24, %v2511_v21  ;;  %v545_v26 = vpop.f32.mrb[2].mxu0 }
 0x138   : > { %v546_v27 = vadd.f32 %v545_v26, %v2508_v20  ;;  %v547_v28 = vpop.f32.mrb[3].mxu0  ;;  %v620_v30 = vmax.f32 %v542_v23, 0.0 }
 0x139   : > { %v548_v29 = vadd.f32 %v547_v28, %v2511_v21  ;;  %v621_v32 = vmax.f32 %v544_v25, 0.0 }
 0x13a   : > { %v622_v31 = vmax.f32 %v546_v27, 0.0 }
 0x13b   : > { %v623_v33 = vmax.f32 %v548_v29, 0.0 }
 0x13c   : > { %v652_v34 = vpack.c.bf16 %v622_v31, %v620_v30 }
 0x13d   : > { %v551_v35 = vpop.f32.mrb[4].mxu0  ;;  %v653_v36 = vpack.c.bf16 %v623_v33, %v621_v32 }
 0x13e   : > { %v552_v37 = vadd.f32 %v551_v35, %v2508_v20  ;;  %v553_v38 = vpop.f32.mrb[5].mxu0 }
 0x13f   : > { %v554_v39 = vadd.f32 %v553_v38, %v2511_v21  ;;  %v555_v40 = vpop.f32.mrb[6].mxu0  ;;  %904 = vmatprep.mubr.bf16.mxu1 %v653_v36 }
 0x140   : > { %v556_v41 = vadd.f32 %v555_v40, %v2508_v20  ;;  %v557_v42 = vpop.f32.mrb[7].mxu0  ;;  %905 = vmatmul.mubr.bf16.vlgmr.msra.gmra.mrb[0].mxu1 %v652_v34  ;;  %v624_v44 = vmax.f32 %v552_v37, 0.0 }
 0x141   : > { %v558_v43 = vadd.f32 %v557_v42, %v2511_v21  ;;  %v625_v46 = vmax.f32 %v554_v39, 0.0 }
 0x142   : > { %v626_v45 = vmax.f32 %v556_v41, 0.0 }
 0x143   : > { %v627_v47 = vmax.f32 %v558_v43, 0.0 }
 0x144   : > { %v654_v48 = vpack.c.bf16 %v626_v45, %v624_v44 }
 0x145   : > { %v655_v49 = vpack.c.bf16 %v627_v47, %v625_v46  ;;  %v561_v50 = vpop.f32.mrb[8].mxu0 }
 0x146   : > { %v562_v51 = vadd.f32 %v561_v50, %v2508_v20  ;;  %v563_v52 = vpop.f32.mrb[9].mxu0 }
 0x147   : > { %v564_v53 = vadd.f32 %v563_v52, %v2511_v21  ;;  %v565_v54 = vpop.f32.mrb[10].mxu0  ;;  %914 = vmatprep.mubr.bf16.mxu1 %v655_v49 }
 0x148   : > { %v566_v55 = vadd.f32 %v565_v54, %v2508_v20  ;;  %v567_v56 = vpop.f32.mrb[11].mxu0  ;;  %915 = vmatmul.mubr.bf16.gmra.mrb[4].mxu1 %v654_v48  ;;  %v628_v58 = vmax.f32 %v562_v51, 0.0 }
 0x149   : > { %v568_v57 = vadd.f32 %v567_v56, %v2511_v21  ;;  %v629_v60 = vmax.f32 %v564_v53, 0.0 }
 0x14a   : > { %v630_v59 = vmax.f32 %v566_v55, 0.0 }
 0x14b   : > { %v631_v61 = vmax.f32 %v568_v57, 0.0 }
 0x14c   : > { %v656_v62 = vpack.c.bf16 %v630_v59, %v628_v58 }
 0x14d   : > { %v657_v63 = vpack.c.bf16 %v631_v61, %v629_v60  ;;  %v571_v0 = vpop.f32.mrb[12].mxu0 }
 0x14e   : > { %v572_v1 = vadd.f32 %v571_v0, %v2508_v20  ;;  %v573_v2 = vpop.f32.mrb[13].mxu0 }
 0x14f   : > { %v574_v3 = vadd.f32 %v573_v2, %v2511_v21  ;;  %v575_v4 = vpop.f32.mrb[14].mxu0  ;;  %924 = vmatprep.mubr.bf16.mxu1 %v657_v63 }
 0x150   : > { %v576_v5 = vadd.f32 %v575_v4, %v2508_v20  ;;  %v577_v6 = vpop.f32.mrb[15].mxu0  ;;  %925 = vmatmul.mubr.bf16.gmra.mrb[8].mxu1 %v656_v62  ;;  %v632_v8 = vmax.f32 %v572_v1, 0.0 }
 0x151   : > { %v578_v7 = vadd.f32 %v577_v6, %v2511_v21  ;;  %v633_v10 = vmax.f32 %v574_v3, 0.0 }
 0x152   : > { %v634_v9 = vmax.f32 %v576_v5, 0.0 }
 0x153   : > { %v635_v11 = vmax.f32 %v578_v7, 0.0 }
 0x154   : > { %v658_v12 = vpack.c.bf16 %v634_v9, %v632_v8 }
 0x155   : > { %v659_v13 = vpack.c.bf16 %v635_v11, %v633_v10  ;;  %v581_v14 = vpop.f32.mrb[16].mxu0  ;;  %v2123_v10 = vld [vmem:[#allocation5 + $0xe4] ss:$8 sps:$4 sm:$0xff]   ;;  %v2121_v11 = vld [vmem:[#allocation5 + $0xe0] ss:$8 sps:$4 sm:$0xff]  }
 0x156   : > { %v582_v15 = vadd.f32 %v581_v14, %v2508_v20  ;;  %v583_v16 = vpop.f32.mrb[17].mxu0  ;;  %1265 = vmatprep.subr.bf16.mxu0 %v2123_v10  ;;  %v2129_v14 = vld [vmem:[%s2792_s7 + $0x48] sm:$0xff]  }
 0x157   : > { %v584_v18 = vadd.f32 %v583_v16, %v2511_v21  ;;  %v585_v22 = vpop.f32.mrb[18].mxu0  ;;  %934 = vmatprep.mubr.bf16.mxu1 %v659_v13  ;;  %1266 = vmatpush1.bf16.msra.mxu0 %v2121_v11  ;;  %v2124_v13 = vld [vmem:[#allocation5 + $0xf0] ss:$8 sps:$4 sm:$0xff]  }
 0x158   : > { %v586_v23 = vadd.f32 %v585_v22, %v2508_v20  ;;  %v587_v24 = vpop.f32.mrb[19].mxu0  ;;  %935 = vmatmul.mubr.bf16.gmra.mrb[12].mxu1 %v658_v12  ;;  %v636_v26 = vmax.f32 %v582_v15, 0.0  ;;  %v2126_v12 = vld [vmem:[#allocation5 + $0xf4] ss:$8 sps:$4 sm:$0xff]   ;;  %v2130_v15 = vld [vmem:[%s2792_s7 + $0x8] sm:$0xff]  }
 0x159   : > { %v588_v25 = vadd.f32 %v587_v24, %v2511_v21  ;;  %v637_v28 = vmax.f32 %v584_v18, 0.0  ;;  %1267 = vmatprep.subr.bf16.mxu0 %v2126_v12  ;;  %v2131_v16 = vld [vmem:[%s2792_s7 + $0x50] sm:$0xff]   ;;  %v2133_v22 = vld [vmem:[%s2792_s7 + $0x58] sm:$0xff]   ;;  %v2574_v24 = vld [vmem:[%s2792_s7 + $0x60] sm:$0xff]  }
 0x15a   : > { %v638_v27 = vmax.f32 %v586_v23, 0.0  ;;  %v2132_v18 = vld [vmem:[%s2792_s7 + $0x10] sm:$0xff]   ;;  %v2569_v23 = vld [vmem:[%s2792_s7 + $0x18] sm:$0xff]  }
 0x15b   : > { %v639_v29 = vmax.f32 %v588_v25, 0.0  ;;  %1268 = vmatpush1.bf16.msra.mxu0 %v2124_v13  ;;  %v2581_v25 = vld [vmem:[%s2792_s7 + $0x20] sm:$0xff]  }
 0x15c   : > { %v660_v30 = vpack.c.bf16 %v638_v27, %v636_v26  ;;  %v2586_v26 = vld [vmem:[%s2792_s7 + $0x68] sm:$0xff]   ;;  %v700_v27 = vld [vmem:[%s2789_s4] sm:$0x3] }
 0x15d   : > { %v661_v31 = vpack.c.bf16 %v639_v29, %v637_v28  ;;  %v591_v32 = vpop.f32.mrb[20].mxu0  ;;  %v2594_v28 = vrot.slane %v700_v27, %v2500_v17  ;;  %v2597_v29 = vrot.slane %v700_v27, %v2505_v19 }
 0x15e   : > { %v592_v33 = vadd.f32 %v591_v32, %v2508_v20  ;;  %v593_v34 = vpop.f32.mrb[21].mxu0 }
 0x15f   : > { %v594_v35 = vadd.f32 %v593_v34, %v2511_v21  ;;  %v595_v36 = vpop.f32.mrb[22].mxu0  ;;  %944 = vmatprep.mubr.bf16.mxu1 %v661_v31 }
 0x160   : > { %v596_v37 = vadd.f32 %v595_v36, %v2508_v20  ;;  %v597_v38 = vpop.f32.mrb[23].mxu0  ;;  %945 = vmatmul.mubr.bf16.gmra.mrb[16].mxu1 %v660_v30  ;;  %v640_v40 = vmax.f32 %v592_v33, 0.0 }
 0x161   : > { %v598_v39 = vadd.f32 %v597_v38, %v2511_v21  ;;  %v641_v42 = vmax.f32 %v594_v35, 0.0 }
 0x162   : > { %v642_v41 = vmax.f32 %v596_v37, 0.0 }
 0x163   : > { %v643_v43 = vmax.f32 %v598_v39, 0.0 }
 0x164   : > { %v662_v44 = vpack.c.bf16 %v642_v41, %v640_v40 }
 0x165   : > { %v663_v45 = vpack.c.bf16 %v643_v43, %v641_v42  ;;  %v601_v46 = vpop.f32.mrb[24].mxu0 }
 0x166   : > { %v602_v47 = vadd.f32 %v601_v46, %v2508_v20  ;;  %v603_v48 = vpop.f32.mrb[25].mxu0 }
 0x167   : > { %v604_v49 = vadd.f32 %v603_v48, %v2511_v21  ;;  %v605_v50 = vpop.f32.mrb[26].mxu0  ;;  %954 = vmatprep.mubr.bf16.mxu1 %v663_v45 }
 0x168   : > { %v606_v51 = vadd.f32 %v605_v50, %v2508_v20  ;;  %v607_v52 = vpop.f32.mrb[27].mxu0  ;;  %955 = vmatmul.mubr.bf16.gmra.mrb[20].mxu1 %v662_v44  ;;  %v644_v54 = vmax.f32 %v602_v47, 0.0 }
 0x169   : > { %v608_v53 = vadd.f32 %v607_v52, %v2511_v21  ;;  %v645_v56 = vmax.f32 %v604_v49, 0.0 }
 0x16a   : > { %v646_v55 = vmax.f32 %v606_v51, 0.0 }
 0x16b   : > { %v647_v57 = vmax.f32 %v608_v53, 0.0 }
 0x16c   : > { %v664_v58 = vpack.c.bf16 %v646_v55, %v644_v54 }
 0x16d   : > { %v665_v59 = vpack.c.bf16 %v647_v57, %v645_v56  ;;  %v611_v60 = vpop.f32.mrb[28].mxu0 }
 0x16e   : > { %v612_v61 = vadd.f32 %v611_v60, %v2508_v20  ;;  %v613_v62 = vpop.f32.mrb[29].mxu0 }
 0x16f   : > { %v614_v63 = vadd.f32 %v613_v62, %v2511_v21  ;;  %v615_v0 = vpop.f32.mrb[30].mxu0  ;;  %964 = vmatprep.mubr.bf16.mxu1 %v665_v59 }
 0x170   : > { %v616_v1 = vadd.f32 %v615_v0, %v2508_v20  ;;  %v617_v2 = vpop.f32.mrb[31].mxu0  ;;  %965 = vmatmul.mubr.bf16.gmra.mrb[24].mxu1 %v664_v58  ;;  %v648_v4 = vmax.f32 %v612_v61, 0.0  ;;  %v2127_v20 = vld [vmem:[%s2792_s7 + $0x40] sm:$0xff]  }
 0x171   : > { %v618_v3 = vadd.f32 %v617_v2, %v2511_v21  ;;  %v649_v6 = vmax.f32 %v614_v63, 0.0  ;;  %v2128_v21 = vld [vmem:[%s2792_s7] sm:$0xff]   ;;  %1931 = vmatprep.subr.bf16.mxu1 %v2127_v20  ;;  %1867 = vmatprep.subr.bf16.mxu0 %v2127_v20 }
 0x172   : > { %v650_v5 = vmax.f32 %v616_v1, 0.0  ;;  %1939 = vmatpush3.bf16.msra.mxu1 %v2128_v21 }
 0x173   : > { %v651_v7 = vmax.f32 %v618_v3, 0.0  ;;  %1932 = vmatprep.subr.bf16.mxu1 %v2129_v14 }
 0x174   : > { %v666_v8 = vpack.c.bf16 %v650_v5, %v648_v4 }
 0x175   : > { %v667_v9 = vpack.c.bf16 %v651_v7, %v649_v6 }
 0x176   : > { %1940 = vmatpush3.bf16.msra.mxu1 %v2130_v15 }
 0x177   : > { %974 = vmatprep.mubr.bf16.mxu1 %v667_v9  ;;  %1933 = vmatprep.subr.bf16.mxu1 %v2131_v16 }
 0x178   : > { %975 = vmatmul.mubr.bf16.gmra.mrb[28].mxu1 %v666_v8 }
 0x17a   : > { %1941 = vmatpush3.bf16.msra.mxu1 %v2132_v18 }
 0x17b   : > { %1934 = vmatprep.subr.bf16.mxu1 %v2133_v22 }
 0x17e   : > { %1942 = vmatpush3.bf16.msra.mxu1 %v2569_v23 }
 0x17f   : > { %1935 = vmatprep.subr.bf16.mxu1 %v2574_v24 }
 0x182   : > { %1943 = vmatpush3.bf16.msra.mxu1 %v2581_v25 }
 0x183   : > { %1936 = vmatprep.subr.bf16.mxu1 %v2586_v26 }
 0x213   : > { %v906_v30 = vpop.f32.mrb[0].mxu1 }
 0x214   : > { %v907_v31 = vadd.f32 %v906_v30, %v2594_v28  ;;  %v908_v32 = vpop.f32.mrb[1].mxu1 }
 0x215   : > { %v909_v33 = vadd.f32 %v908_v32, %v2597_v29  ;;  %v910_v34 = vpop.f32.mrb[2].mxu1 }
 0x216   : > { %v911_v35 = vadd.f32 %v910_v34, %v2594_v28  ;;  %v912_v36 = vpop.f32.mrb[3].mxu1  ;;  %v985_v38 = vmax.f32 %v907_v31, 0.0 }
 0x217   : > { %v913_v37 = vadd.f32 %v912_v36, %v2597_v29  ;;  %v986_v40 = vmax.f32 %v909_v33, 0.0 }
 0x218   : > { %v987_v39 = vmax.f32 %v911_v35, 0.0 }
 0x219   : > { %v988_v41 = vmax.f32 %v913_v37, 0.0 }
 0x21a   : > { %v1017_v42 = vpack.c.bf16 %v987_v39, %v985_v38 }
 0x21b   : > { %v1018_v43 = vpack.c.bf16 %v988_v41, %v986_v40  ;;  %v916_v44 = vpop.f32.mrb[4].mxu1 }
 0x21c   : > { %v917_v45 = vadd.f32 %v916_v44, %v2594_v28  ;;  %v918_v46 = vpop.f32.mrb[5].mxu1 }
 0x21d   : > { %v919_v47 = vadd.f32 %v918_v46, %v2597_v29  ;;  %v920_v48 = vpop.f32.mrb[6].mxu1  ;;  %1269 = vmatprep.mubr.bf16.mxu0 %v1018_v43 }
 0x21e   : > { %v921_v49 = vadd.f32 %v920_v48, %v2594_v28  ;;  %v922_v50 = vpop.f32.mrb[7].mxu1  ;;  %1270 = vmatmul.mubr.bf16.vlgmr.msra.gmra.mrb[32].mxu0 %v1017_v42  ;;  %v989_v52 = vmax.f32 %v917_v45, 0.0 }
 0x21f   : > { %v923_v51 = vadd.f32 %v922_v50, %v2597_v29  ;;  %1868 = vmatpush3.bf16.msra.mxu0 %v2128_v21  ;;  %v990_v54 = vmax.f32 %v919_v47, 0.0 }
 0x220   : > { %v991_v53 = vmax.f32 %v921_v49, 0.0  ;;  %1869 = vmatprep.subr.bf16.mxu0 %v2129_v14 }
 0x221   : > { %v992_v55 = vmax.f32 %v923_v51, 0.0 }
 0x222   : > { %v1019_v56 = vpack.c.bf16 %v991_v53, %v989_v52 }
 0x223   : > { %v1020_v57 = vpack.c.bf16 %v992_v55, %v990_v54  ;;  %v926_v58 = vpop.f32.mrb[8].mxu1  ;;  %1870 = vmatpush3.bf16.msra.mxu0 %v2130_v15 }
 0x224   : > { %v927_v59 = vadd.f32 %v926_v58, %v2594_v28  ;;  %v928_v60 = vpop.f32.mrb[9].mxu1  ;;  %1871 = vmatprep.subr.bf16.mxu0 %v2131_v16 }
 0x225   : > { %v929_v61 = vadd.f32 %v928_v60, %v2597_v29  ;;  %v930_v62 = vpop.f32.mrb[10].mxu1  ;;  %1279 = vmatprep.mubr.bf16.mxu0 %v1020_v57 }
 0x226   : > { %v931_v63 = vadd.f32 %v930_v62, %v2594_v28  ;;  %v932_v0 = vpop.f32.mrb[11].mxu1  ;;  %1280 = vmatmul.mubr.bf16.gmra.mrb[36].mxu0 %v1019_v56  ;;  %v993_v2 = vmax.f32 %v927_v59, 0.0 }
 0x227   : > { %v933_v1 = vadd.f32 %v932_v0, %v2597_v29  ;;  %1872 = vmatpush3.bf16.msra.mxu0 %v2132_v18  ;;  %v994_v4 = vmax.f32 %v929_v61, 0.0 }
 0x228   : > { %v995_v3 = vmax.f32 %v931_v63, 0.0  ;;  %1873 = vmatprep.subr.bf16.mxu0 %v2133_v22 }
 0x229   : > { %v996_v5 = vmax.f32 %v933_v1, 0.0 }
 0x22a   : > { %v1021_v6 = vpack.c.bf16 %v995_v3, %v993_v2 }
 0x22b   : > { %v1022_v7 = vpack.c.bf16 %v996_v5, %v994_v4  ;;  %v936_v8 = vpop.f32.mrb[12].mxu1  ;;  %1874 = vmatpush3.bf16.msra.mxu0 %v2569_v23 }
 0x22c   : > { %v937_v9 = vadd.f32 %v936_v8, %v2594_v28  ;;  %v938_v10 = vpop.f32.mrb[13].mxu1  ;;  %1875 = vmatprep.subr.bf16.mxu0 %v2574_v24 }
 0x22d   : > { %v939_v11 = vadd.f32 %v938_v10, %v2597_v29  ;;  %v940_v12 = vpop.f32.mrb[14].mxu1  ;;  %1289 = vmatprep.mubr.bf16.mxu0 %v1022_v7 }
 0x22e   : > { %v941_v13 = vadd.f32 %v940_v12, %v2594_v28  ;;  %v942_v20 = vpop.f32.mrb[15].mxu1  ;;  %1290 = vmatmul.mubr.bf16.gmra.mrb[40].mxu0 %v1021_v6  ;;  %v997_v14 = vmax.f32 %v937_v9, 0.0 }
 0x22f   : > { %v943_v21 = vadd.f32 %v942_v20, %v2597_v29  ;;  %1876 = vmatpush3.bf16.msra.mxu0 %v2581_v25  ;;  %v998_v16 = vmax.f32 %v939_v11, 0.0 }
 0x230   : > { %v999_v15 = vmax.f32 %v941_v13, 0.0  ;;  %1877 = vmatprep.subr.bf16.mxu0 %v2586_v26 }
 0x231   : > { %v1000_v18 = vmax.f32 %v943_v21, 0.0 }
 0x232   : > { %v1023_v22 = vpack.c.bf16 %v999_v15, %v997_v14 }
 0x233   : > { %v1024_v23 = vpack.c.bf16 %v1000_v18, %v998_v16  ;;  %v946_v24 = vpop.f32.mrb[16].mxu1  ;;  %v2138_v16 = vld [vmem:[%s2792_s7 + $0x28] sm:$0xff]   ;;  %v2141_v18 = vld [vmem:[%s2792_s7 + $0x78] sm:$0xff]  }
 0x234   : > { %v947_v27 = vadd.f32 %v946_v24, %v2594_v28  ;;  %v948_v30 = vpop.f32.mrb[17].mxu1  ;;  %1878 = vmatpush3.bf16.msra.mxu0 %v2138_v16  ;;  %1944 = vmatpush3.bf16.msra.mxu1 %v2138_v16 }
 0x235   : > { %v949_v31 = vadd.f32 %v948_v30, %v2597_v29  ;;  %v950_v32 = vpop.f32.mrb[18].mxu1  ;;  %1299 = vmatprep.mubr.bf16.mxu0 %v1024_v23  ;;  %v1065_v23 = vld [vmem:[%s2791_s6] sm:$0x3] }
 0x236   : > { %v951_v33 = vadd.f32 %v950_v32, %v2594_v28  ;;  %v952_v34 = vpop.f32.mrb[19].mxu1  ;;  %1300 = vmatmul.mubr.bf16.gmra.mrb[44].mxu0 %v1023_v22  ;;  %v1001_v35 = vmax.f32 %v947_v27, 0.0  ;;  %v2142_v22 = vld [vmem:[%s2792_s7 + $0x38] sm:$0xff]   ;;  %v2654_v24 = vrot.slane %v1065_v23, %v2500_v17  ;;  %v2657_v27 = vrot.slane %v1065_v23, %v2505_v19 }
 0x237   : > { %v953_v25 = vadd.f32 %v952_v34, %v2597_v29  ;;  %v1002_v36 = vmax.f32 %v949_v31, 0.0 }
 0x238   : > { %v1003_v26 = vmax.f32 %v951_v33, 0.0 }
 0x239   : > { %v1004_v37 = vmax.f32 %v953_v25, 0.0 }
 0x23a   : > { %v1025_v38 = vpack.c.bf16 %v1003_v26, %v1001_v35 }
 0x23b   : > { %v1026_v39 = vpack.c.bf16 %v1004_v37, %v1002_v36  ;;  %v956_v40 = vpop.f32.mrb[20].mxu1 }
 0x23c   : > { %v957_v41 = vadd.f32 %v956_v40, %v2594_v28  ;;  %v958_v42 = vpop.f32.mrb[21].mxu1 }
 0x23d   : > { %v959_v43 = vadd.f32 %v958_v42, %v2597_v29  ;;  %v960_v44 = vpop.f32.mrb[22].mxu1  ;;  %1309 = vmatprep.mubr.bf16.mxu0 %v1026_v39 }
 0x23e   : > { %v961_v45 = vadd.f32 %v960_v44, %v2594_v28  ;;  %v962_v46 = vpop.f32.mrb[23].mxu1  ;;  %1310 = vmatmul.mubr.bf16.gmra.mrb[48].mxu0 %v1025_v38  ;;  %v1005_v48 = vmax.f32 %v957_v41, 0.0 }
 0x23f   : > { %v963_v47 = vadd.f32 %v962_v46, %v2597_v29  ;;  %v1006_v50 = vmax.f32 %v959_v43, 0.0 }
 0x240   : > { %v1007_v49 = vmax.f32 %v961_v45, 0.0 }
 0x241   : > { %v1008_v51 = vmax.f32 %v963_v47, 0.0 }
 0x242   : > { %v1027_v52 = vpack.c.bf16 %v1007_v49, %v1005_v48 }
 0x243   : > { %v1028_v53 = vpack.c.bf16 %v1008_v51, %v1006_v50  ;;  %v966_v54 = vpop.f32.mrb[24].mxu1 }
 0x244   : > { %v967_v55 = vadd.f32 %v966_v54, %v2594_v28  ;;  %v968_v56 = vpop.f32.mrb[25].mxu1 }
 0x245   : > { %v969_v57 = vadd.f32 %v968_v56, %v2597_v29  ;;  %v970_v58 = vpop.f32.mrb[26].mxu1  ;;  %1319 = vmatprep.mubr.bf16.mxu0 %v1028_v53 }
 0x246   : > { %v971_v59 = vadd.f32 %v970_v58, %v2594_v28  ;;  %v972_v60 = vpop.f32.mrb[27].mxu1  ;;  %1320 = vmatmul.mubr.bf16.gmra.mrb[52].mxu0 %v1027_v52  ;;  %v1009_v62 = vmax.f32 %v967_v55, 0.0 }
 0x247   : > { %v973_v61 = vadd.f32 %v972_v60, %v2597_v29  ;;  %v1010_v0 = vmax.f32 %v969_v57, 0.0 }
 0x248   : > { %v1011_v63 = vmax.f32 %v971_v59, 0.0 }
 0x249   : > { %v1012_v1 = vmax.f32 %v973_v61, 0.0 }
 0x24a   : > { %v1029_v2 = vpack.c.bf16 %v1011_v63, %v1009_v62 }
 0x24b   : > { %v1030_v3 = vpack.c.bf16 %v1012_v1, %v1010_v0  ;;  %v976_v4 = vpop.f32.mrb[28].mxu1 }
 0x24c   : > { %v977_v5 = vadd.f32 %v976_v4, %v2594_v28  ;;  %v978_v6 = vpop.f32.mrb[29].mxu1 }
 0x24d   : > { %v979_v7 = vadd.f32 %v978_v6, %v2597_v29  ;;  %v980_v8 = vpop.f32.mrb[30].mxu1  ;;  %1329 = vmatprep.mubr.bf16.mxu0 %v1030_v3 }
 0x24e   : > { %v981_v9 = vadd.f32 %v980_v8, %v2594_v28  ;;  %v982_v10 = vpop.f32.mrb[31].mxu1  ;;  %1330 = vmatmul.mubr.bf16.gmra.mrb[56].mxu0 %v1029_v2  ;;  %v1013_v12 = vmax.f32 %v977_v5, 0.0  ;;  %v2139_v28 = vld [vmem:[%s2792_s7 + $0x70] sm:$0xff]  }
 0x24f   : > { %v983_v11 = vadd.f32 %v982_v10, %v2597_v29  ;;  %v1014_v20 = vmax.f32 %v979_v7, 0.0  ;;  %v2140_v29 = vld [vmem:[%s2792_s7 + $0x30] sm:$0xff]   ;;  %1879 = vmatprep.subr.bf16.mxu0 %v2139_v28  ;;  %1937 = vmatprep.subr.bf16.mxu1 %v2139_v28 }
 0x250   : > { %v1015_v13 = vmax.f32 %v981_v9, 0.0  ;;  %1880 = vmatpush3.bf16.msra.mxu0 %v2140_v29  ;;  %1945 = vmatpush3.bf16.msra.mxu1 %v2140_v29 }
 0x251   : > { %v1016_v21 = vmax.f32 %v983_v11, 0.0  ;;  %1881 = vmatprep.subr.bf16.mxu0 %v2141_v18  ;;  %1938 = vmatprep.subr.bf16.mxu1 %v2141_v18 }
 0x252   : > { %v1031_v14 = vpack.c.bf16 %v1015_v13, %v1013_v12 }
 0x253   : > { %v1032_v15 = vpack.c.bf16 %v1016_v21, %v1014_v20 }
 0x254   : > { %1882 = vmatpush3.bf16.msra.mxu0 %v2142_v22  ;;  %1946 = vmatpush3.bf16.msra.mxu1 %v2142_v22 }
 0x255   : > { %1339 = vmatprep.mubr.bf16.mxu0 %v1032_v15 }
 0x256   : > { %1340 = vmatmul.mubr.bf16.gmra.mrb[60].mxu0 %v1031_v14 }
 0x2f1   : > { %v1271_v30 = vpop.f32.mrb[32].mxu0 }
 0x2f2   : > { %v1272_v31 = vadd.f32 %v1271_v30, %v2654_v24  ;;  %v1273_v32 = vpop.f32.mrb[33].mxu0 }
 0x2f3   : > { %v1274_v33 = vadd.f32 %v1273_v32, %v2657_v27  ;;  %v1275_v34 = vpop.f32.mrb[34].mxu0 }
 0x2f4   : > { %v1276_v25 = vadd.f32 %v1275_v34, %v2654_v24  ;;  %v1277_v35 = vpop.f32.mrb[35].mxu0  ;;  %v1350_v36 = vmax.f32 %v1272_v31, 0.0 }
 0x2f5   : > { %v1278_v26 = vadd.f32 %v1277_v35, %v2657_v27  ;;  %v1351_v38 = vmax.f32 %v1274_v33, 0.0 }
 0x2f6   : > { %v1352_v37 = vmax.f32 %v1276_v25, 0.0 }
 0x2f7   : > { %v1353_v17 = vmax.f32 %v1278_v26, 0.0 }
 0x2f8   : > { %v1382_v39 = vpack.c.bf16 %v1352_v37, %v1350_v36 }
 0x2f9   : > { %v1383_v40 = vpack.c.bf16 %v1353_v17, %v1351_v38  ;;  %v1281_v19 = vpop.f32.mrb[36].mxu0 }
 0x2fa   : > { %v1282_v41 = vadd.f32 %v1281_v19, %v2654_v24  ;;  %v1283_v42 = vpop.f32.mrb[37].mxu0 }
 0x2fb   : > { %v1284_v43 = vadd.f32 %v1283_v42, %v2657_v27  ;;  %v1285_v44 = vpop.f32.mrb[38].mxu0  ;;  %1565 = vmatprep.mubr.bf16.mxu0 %v1383_v40 }
 0x2fc   : > { %v1286_v45 = vadd.f32 %v1285_v44, %v2654_v24  ;;  %v1287_v46 = vpop.f32.mrb[39].mxu0  ;;  %1566 = vmatmul.mubr.bf16.vlgmr.msra.gmra.mrb[64].mxu0 %v1382_v39  ;;  %v1354_v48 = vmax.f32 %v1282_v41, 0.0 }
 0x2fd   : > { %v1288_v47 = vadd.f32 %v1287_v46, %v2657_v27  ;;  %v1355_v50 = vmax.f32 %v1284_v43, 0.0 }
 0x2fe   : > { %v1356_v49 = vmax.f32 %v1286_v45, 0.0 }
 0x2ff   : > { %v1357_v51 = vmax.f32 %v1288_v47, 0.0 }
 0x300   : > { %v1384_v52 = vpack.c.bf16 %v1356_v49, %v1354_v48 }
 0x301   : > { %v1385_v53 = vpack.c.bf16 %v1357_v51, %v1355_v50  ;;  %v1291_v54 = vpop.f32.mrb[40].mxu0 }
 0x302   : > { %v1292_v55 = vadd.f32 %v1291_v54, %v2654_v24  ;;  %v1293_v56 = vpop.f32.mrb[41].mxu0 }
 0x303   : > { %v1294_v57 = vadd.f32 %v1293_v56, %v2657_v27  ;;  %v1295_v58 = vpop.f32.mrb[42].mxu0  ;;  %1573 = vmatprep.mubr.bf16.mxu0 %v1385_v53 }
 0x304   : > { %v1296_v59 = vadd.f32 %v1295_v58, %v2654_v24  ;;  %v1297_v60 = vpop.f32.mrb[43].mxu0  ;;  %1574 = vmatmul.mubr.bf16.gmra.mrb[68].mxu0 %v1384_v52  ;;  %v1358_v62 = vmax.f32 %v1292_v55, 0.0 }
 0x305   : > { %v1298_v61 = vadd.f32 %v1297_v60, %v2657_v27  ;;  %v1359_v0 = vmax.f32 %v1294_v57, 0.0 }
 0x306   : > { %v1360_v63 = vmax.f32 %v1296_v59, 0.0 }
 0x307   : > { %v1361_v1 = vmax.f32 %v1298_v61, 0.0 }
 0x308   : > { %v1386_v2 = vpack.c.bf16 %v1360_v63, %v1358_v62 }
 0x309   : > { %v1387_v3 = vpack.c.bf16 %v1361_v1, %v1359_v0  ;;  %v1301_v4 = vpop.f32.mrb[44].mxu0 }
 0x30a   : > { %v1302_v5 = vadd.f32 %v1301_v4, %v2654_v24  ;;  %v1303_v6 = vpop.f32.mrb[45].mxu0 }
 0x30b   : > { %v1304_v7 = vadd.f32 %v1303_v6, %v2657_v27  ;;  %v1305_v8 = vpop.f32.mrb[46].mxu0  ;;  %1581 = vmatprep.mubr.bf16.mxu0 %v1387_v3 }
 0x30c   : > { %v1306_v9 = vadd.f32 %v1305_v8, %v2654_v24  ;;  %v1307_v10 = vpop.f32.mrb[47].mxu0  ;;  %1582 = vmatmul.mubr.bf16.gmra.mrb[72].mxu0 %v1386_v2  ;;  %v1362_v12 = vmax.f32 %v1302_v5, 0.0 }
 0x30d   : > { %v1308_v11 = vadd.f32 %v1307_v10, %v2657_v27  ;;  %v1363_v20 = vmax.f32 %v1304_v7, 0.0 }
 0x30e   : > { %v1364_v13 = vmax.f32 %v1306_v9, 0.0 }
 0x30f   : > { %v1365_v21 = vmax.f32 %v1308_v11, 0.0 }
 0x310   : > { %v1388_v14 = vpack.c.bf16 %v1364_v13, %v1362_v12 }
 0x311   : > { %v1389_v15 = vpack.c.bf16 %v1365_v21, %v1363_v20  ;;  %v1311_v16 = vpop.f32.mrb[48].mxu0 }
 0x312   : > { %v1312_v28 = vadd.f32 %v1311_v16, %v2654_v24  ;;  %v1313_v29 = vpop.f32.mrb[49].mxu0 }
 0x313   : > { %v1314_v18 = vadd.f32 %v1313_v29, %v2657_v27  ;;  %v1315_v22 = vpop.f32.mrb[50].mxu0  ;;  %1589 = vmatprep.mubr.bf16.mxu1 %v1389_v15 }
 0x314   : > { %v1316_v23 = vadd.f32 %v1315_v22, %v2654_v24  ;;  %v1317_v30 = vpop.f32.mrb[51].mxu0  ;;  %1590 = vmatmul.mubr.bf16.vlgmr.msra.gmra.mrb[32].mxu1 %v1388_v14  ;;  %v1366_v32 = vmax.f32 %v1312_v28, 0.0 }
 0x315   : > { %v1318_v31 = vadd.f32 %v1317_v30, %v2657_v27  ;;  %v1367_v34 = vmax.f32 %v1314_v18, 0.0 }
 0x316   : > { %v1368_v33 = vmax.f32 %v1316_v23, 0.0 }
 0x317   : > { %v1369_v25 = vmax.f32 %v1318_v31, 0.0 }
 0x318   : > { %v1390_v35 = vpack.c.bf16 %v1368_v33, %v1366_v32 }
 0x319   : > { %v1391_v26 = vpack.c.bf16 %v1369_v25, %v1367_v34  ;;  %v1321_v36 = vpop.f32.mrb[52].mxu0 }
 0x31a   : > { %v1322_v37 = vadd.f32 %v1321_v36, %v2654_v24  ;;  %v1323_v38 = vpop.f32.mrb[53].mxu0 }
 0x31b   : > { %v1324_v17 = vadd.f32 %v1323_v38, %v2657_v27  ;;  %v1325_v39 = vpop.f32.mrb[54].mxu0  ;;  %1597 = vmatprep.mubr.bf16.mxu1 %v1391_v26 }
 0x31c   : > { %v1326_v40 = vadd.f32 %v1325_v39, %v2654_v24  ;;  %v1327_v19 = vpop.f32.mrb[55].mxu0  ;;  %1598 = vmatmul.mubr.bf16.gmra.mrb[36].mxu1 %v1390_v35  ;;  %v1370_v42 = vmax.f32 %v1322_v37, 0.0 }
 0x31d   : > { %v1328_v41 = vadd.f32 %v1327_v19, %v2657_v27  ;;  %v1371_v44 = vmax.f32 %v1324_v17, 0.0 }
 0x31e   : > { %v1372_v43 = vmax.f32 %v1326_v40, 0.0 }
 0x31f   : > { %v1373_v45 = vmax.f32 %v1328_v41, 0.0 }
 0x320   : > { %v1392_v46 = vpack.c.bf16 %v1372_v43, %v1370_v42 }
 0x321   : > { %v1393_v47 = vpack.c.bf16 %v1373_v45, %v1371_v44  ;;  %v1331_v48 = vpop.f32.mrb[56].mxu0 }
 0x322   : > { %v1332_v49 = vadd.f32 %v1331_v48, %v2654_v24  ;;  %v1333_v50 = vpop.f32.mrb[57].mxu0 }
 0x323   : > { %v1334_v51 = vadd.f32 %v1333_v50, %v2657_v27  ;;  %v1335_v52 = vpop.f32.mrb[58].mxu0  ;;  %1605 = vmatprep.mubr.bf16.mxu1 %v1393_v47 }
 0x324   : > { %v1336_v53 = vadd.f32 %v1335_v52, %v2654_v24  ;;  %v1337_v54 = vpop.f32.mrb[59].mxu0  ;;  %1606 = vmatmul.mubr.bf16.gmra.mrb[40].mxu1 %v1392_v46  ;;  %v1374_v56 = vmax.f32 %v1332_v49, 0.0 }
 0x325   : > { %v1338_v55 = vadd.f32 %v1337_v54, %v2657_v27  ;;  %v1375_v58 = vmax.f32 %v1334_v51, 0.0 }
 0x326   : > { %v1376_v57 = vmax.f32 %v1336_v53, 0.0 }
 0x327   : > { %v1377_v59 = vmax.f32 %v1338_v55, 0.0 }
 0x328   : > { %v1394_v60 = vpack.c.bf16 %v1376_v57, %v1374_v56 }
 0x329   : > { %v1395_v61 = vpack.c.bf16 %v1377_v59, %v1375_v58  ;;  %v1341_v62 = vpop.f32.mrb[60].mxu0 }
 0x32a   : > { %v1342_v63 = vadd.f32 %v1341_v62, %v2654_v24  ;;  %v1343_v0 = vpop.f32.mrb[61].mxu0 }
 0x32b   : > { %v1344_v1 = vadd.f32 %v1343_v0, %v2657_v27  ;;  %v1345_v2 = vpop.f32.mrb[62].mxu0  ;;  %1613 = vmatprep.mubr.bf16.mxu1 %v1395_v61 }
 0x32c   : > { %v1346_v3 = vadd.f32 %v1345_v2, %v2654_v24  ;;  %v1347_v4 = vpop.f32.mrb[63].mxu0  ;;  %1614 = vmatmul.mubr.bf16.gmra.mrb[44].mxu1 %v1394_v60  ;;  %v1378_v6 = vmax.f32 %v1342_v63, 0.0  ;;  %v2697_v24 = vld [vmem:[%s2793_s8] ss:$0 sm:$0xff] }
 0x32d   : > { %v1348_v5 = vadd.f32 %v1347_v4, %v2657_v27  ;;  %v1379_v8 = vmax.f32 %v1344_v1, 0.0 }
 0x32e   : > { %v1380_v7 = vmax.f32 %v1346_v3, 0.0 }
 0x32f   : > { %v1381_v9 = vmax.f32 %v1348_v5, 0.0 }
 0x330   : > { %v1396_v10 = vpack.c.bf16 %v1380_v7, %v1378_v6 }
 0x331   : > { %v1397_v11 = vpack.c.bf16 %v1381_v9, %v1379_v8 }
 0x333   : > { %1621 = vmatprep.mubr.bf16.mxu1 %v1397_v11 }
 0x334   : > { %1622 = vmatmul.mubr.bf16.gmra.mrb[48].mxu1 %v1396_v10 }
 0x3cf   : > { %v1883_v12 = vpop.f32.mrb[64].mxu0 }
 0x3d0   : > { %v1884_v13 = vpop.f32.mrb[65].mxu0 }
 0x3d1   : > { %v1885_v20 = vadd.f32 %v1884_v13, %v1883_v12  ;;  %v1886_v27 = vpop.f32.mrb[66].mxu0 }
 0x3d2   : > { %v1887_v21 = vpop.f32.mrb[67].mxu0 }
 0x3d3   : > { %v1568_v14 = vadd.f32 %v1885_v20, %v2697_v24  ;;  %v1888_v15 = vadd.f32 %v1887_v21, %v1886_v27 }
 0x3d5   : > { %1630 = vst [vmem:[%s2700_s21] sm:$0xff] %v1568_v14  ;;  %v1571_v16 = vadd.f32 %v1888_v15, %v2697_v24 }
 0x3d7   : > { %1631 = vst [vmem:[%s2700_s21 + $0x8] sm:$0xff] %v1571_v16  ;;  %v1889_v28 = vpop.f32.mrb[68].mxu0 }
 0x3d8   : > { %v1890_v29 = vpop.f32.mrb[69].mxu0 }
 0x3d9   : > { %v1891_v18 = vadd.f32 %v1890_v29, %v1889_v28  ;;  %v1892_v22 = vpop.f32.mrb[70].mxu0 }
 0x3da   : > { %v1893_v23 = vpop.f32.mrb[71].mxu0 }
 0x3db   : > { %v1576_v30 = vadd.f32 %v1891_v18, %v2697_v24  ;;  %v1894_v31 = vadd.f32 %v1893_v23, %v1892_v22 }
 0x3dd   : > { %1632 = vst [vmem:[%s2700_s21 + $0x10] sm:$0xff] %v1576_v30  ;;  %v1579_v32 = vadd.f32 %v1894_v31, %v2697_v24 }
 0x3df   : > { %1633 = vst [vmem:[%s2700_s21 + $0x18] sm:$0xff] %v1579_v32  ;;  %v1895_v33 = vpop.f32.mrb[72].mxu0 }
 0x3e0   : > { %v1896_v34 = vpop.f32.mrb[73].mxu0 }
 0x3e1   : > { %v1897_v25 = vadd.f32 %v1896_v34, %v1895_v33  ;;  %v1898_v35 = vpop.f32.mrb[74].mxu0 }
 0x3e2   : > { %v1899_v26 = vpop.f32.mrb[75].mxu0 }
 0x3e3   : > { %v1584_v36 = vadd.f32 %v1897_v25, %v2697_v24  ;;  %v1900_v37 = vadd.f32 %v1899_v26, %v1898_v35 }
 0x3e5   : > { %1634 = vst [vmem:[%s2700_s21 + $0x20] sm:$0xff] %v1584_v36  ;;  %v1587_v38 = vadd.f32 %v1900_v37, %v2697_v24 }
 0x3e7   : > { %1635 = vst [vmem:[%s2700_s21 + $0x28] sm:$0xff] %v1587_v38  ;;  %v1901_v17 = vpop.f32.mrb[32].mxu1 }
 0x3e8   : > { %v1902_v39 = vpop.f32.mrb[33].mxu1 }
 0x3e9   : > { %v1903_v40 = vadd.f32 %v1902_v39, %v1901_v17  ;;  %v1904_v19 = vpop.f32.mrb[34].mxu1 }
 0x3ea   : > { %v1905_v41 = vpop.f32.mrb[35].mxu1 }
 0x3eb   : > { %v1592_v42 = vadd.f32 %v1903_v40, %v2697_v24  ;;  %v1906_v43 = vadd.f32 %v1905_v41, %v1904_v19 }
 0x3ed   : > { %1636 = vst [vmem:[%s2700_s21 + $0x30] sm:$0xff] %v1592_v42  ;;  %v1595_v44 = vadd.f32 %v1906_v43, %v2697_v24 }
 0x3ef   : > { %1637 = vst [vmem:[%s2700_s21 + $0x38] sm:$0xff] %v1595_v44  ;;  %v1907_v45 = vpop.f32.mrb[36].mxu1 }
 0x3f0   : > { %v1908_v46 = vpop.f32.mrb[37].mxu1 }
 0x3f1   : > { %v1909_v47 = vadd.f32 %v1908_v46, %v1907_v45  ;;  %v1910_v48 = vpop.f32.mrb[38].mxu1 }
 0x3f2   : > { %v1911_v49 = vpop.f32.mrb[39].mxu1 }
 0x3f3   : > { %v1600_v50 = vadd.f32 %v1909_v47, %v2697_v24  ;;  %v1912_v51 = vadd.f32 %v1911_v49, %v1910_v48 }
 0x3f5   : > { %1638 = vst [vmem:[%s2700_s21 + $0x40] sm:$0xff] %v1600_v50  ;;  %v1603_v52 = vadd.f32 %v1912_v51, %v2697_v24 }
 0x3f7   : > { %1639 = vst [vmem:[%s2700_s21 + $0x48] sm:$0xff] %v1603_v52  ;;  %v1913_v53 = vpop.f32.mrb[40].mxu1 }
 0x3f8   : > { %v1914_v54 = vpop.f32.mrb[41].mxu1 }
 0x3f9   : > { %v1915_v55 = vadd.f32 %v1914_v54, %v1913_v53  ;;  %v1916_v56 = vpop.f32.mrb[42].mxu1 }
 0x3fa   : > { %v1917_v57 = vpop.f32.mrb[43].mxu1 }
 0x3fb   : > { %v1608_v58 = vadd.f32 %v1915_v55, %v2697_v24  ;;  %v1918_v59 = vadd.f32 %v1917_v57, %v1916_v56 }
 0x3fd   : > { %1640 = vst [vmem:[%s2700_s21 + $0x50] sm:$0xff] %v1608_v58  ;;  %v1611_v60 = vadd.f32 %v1918_v59, %v2697_v24 }
 0x3ff   : > { %1641 = vst [vmem:[%s2700_s21 + $0x58] sm:$0xff] %v1611_v60  ;;  %v1919_v61 = vpop.f32.mrb[44].mxu1 }
 0x400   : > { %v1920_v62 = vpop.f32.mrb[45].mxu1 }
 0x401   : > { %v1921_v63 = vadd.f32 %v1920_v62, %v1919_v61  ;;  %v1922_v0 = vpop.f32.mrb[46].mxu1 }
 0x402   : > { %v1923_v1 = vpop.f32.mrb[47].mxu1 }
 0x403   : > { %v1616_v2 = vadd.f32 %v1921_v63, %v2697_v24  ;;  %v1924_v3 = vadd.f32 %v1923_v1, %v1922_v0 }
 0x405   : > { %1642 = vst [vmem:[%s2700_s21 + $0x60] sm:$0xff] %v1616_v2  ;;  %v1619_v4 = vadd.f32 %v1924_v3, %v2697_v24 }
 0x407   : > { %1643 = vst [vmem:[%s2700_s21 + $0x68] sm:$0xff] %v1619_v4  ;;  %v1925_v5 = vpop.f32.mrb[48].mxu1 }
 0x408   : > { %v1926_v6 = vpop.f32.mrb[49].mxu1 }
 0x409   : > { %v1927_v7 = vadd.f32 %v1926_v6, %v1925_v5  ;;  %v1928_v8 = vpop.f32.mrb[50].mxu1 }
 0x40a   : > { %v1929_v9 = vpop.f32.mrb[51].mxu1 }
 0x40b   : > { %v1624_v10 = vadd.f32 %v1927_v7, %v2697_v24  ;;  %v1930_v11 = vadd.f32 %v1929_v9, %v1928_v8 }
 0x40d   : > { %1644 = vst [vmem:[%s2700_s21 + $0x70] sm:$0xff] %v1624_v10  ;;  %v1627_v12 = vadd.f32 %v1930_v11, %v2697_v24 }
 0x40f   : > { %1645 = vst [vmem:[%s2700_s21 + $0x78] sm:$0xff] %v1627_v12 }
 0x410   : > { %2212 = shalt.err (!%p2209_p11)
}
 0x411   : > { %s2213_s25 = scalar_lea.hbm %s2735_s29, 2048  ;;  %s2217_s15 = scalar_lea.hbm %s2794_s9, 4096 }
 0x412   : > { %p2214_p13 = scmp.ne.s32.totalorder %s2735_s29, %s2213_s25  ;;  %p2218_p6 = scmp.lt.u32.totalorder %s2735_s29, %s2794_s9 }
 0x413   : > { %p2219_p9 = scmp.lt.u32.totalorder %s2217_s15, %s2213_s25  ;;  %p2221_p10 = scmp.lt.u32.totalorder %s2213_s25, %s2735_s29 }
 0x414   : > { %p2215_p5 = pnand %p2214_p13, %p2813_p1 }
 0x415   : > { %p2220_p12 = por %p2219_p9, %p2218_p6 }
 0x416   : > { %p2216_p0 = pneg %p2215_p5 }
 0x417   : > { %p2222_p2 = por %p2221_p10, %p2220_p12 }
 0x419   : > { %p2223_p3 = pnand %p2222_p2, %p2216_p0 }
 0x41b   : > { %2226 = shalt.err (!%p2223_p3)
}
 0x41c   : > { %s2277_s24 = smov 128   ;;  %s2278_s26 = smov 8  }
 0x41d   : > { %1955 = dma.vmem_to_hbm [thread:$0]  (%p2813_p1), %s2737_s27, 2048, %s2735_s29, %s2744_s13, %s2277_s24, %s2277_s24, %s2278_s26  }
 0x41e PF: > { %p1972_p4 = scmp.ge.s32.totalorder %s2269_s12, 2  ;;  %s1675_s28 = sand.u32 1, %s2257_s30  }
 0x41f   : > { %p2814_p7 = scmp.ne.s32.totalorder %s2805_s20, 0  ;;  %s1676_s14 = scalar_lea.sflag [#allocation4], %s1675_s28 }
 0x421   : > { %p1965_p8 = pnand %p1972_p4, %p2814_p7 }
 0x423   : > { %2252 = dma.done.wait (!%p1965_p8), %s1676_s14, 2048  }
 0x424   : > { %2254 = vsyncadd (!%p1965_p8), %s1676_s14, 4294965248  ;;  %s2815_s12 = sld [smem:[#allocation12_spill]]  ;;  %s2816_s16 = sld [smem:[#allocation11_spill]] }
 0x425   : > { %s2817_s11 = sld [smem:[#allocation13_spill]]  ;;  %s2818_s30 = smov %s2261_s10 }
 0x42a   : > { %p21_p11 = scmp.ge.s32.totalorder %s2815_s12, 4   ;;  %s2819_s10 = smov %s2816_s16 }
 0x42c   :  { %23 = sbr.rel (!%p21_p11) target bundleno = 5 (0x5), region = 100 }
 0x433   :  { %1681 = vsyncpa [#allocation3], 1 }
 0x434   :  { %1683 = vsyncpa [#allocation3 + $0x1], 1 }
 0x435   :  { %1684 = vsyncpa [#allocation6], 1 }
 0x436   :  { %1685 = vsyncpa [#allocation4], 1 }
 0x437   :  { %1687 = vsyncpa [#allocation4 + $0x1], 1 }

</bundles_post_ra>
